<compile_context>
chip_gen: v5e
topology: v5e:2x2
jax: 0.10.0
libtpu: 0.0.40
codegen_flags: <defaults>
</compile_context>

<pallas_src>
import jax
import jax.numpy as jnp
from jax.experimental import pallas as pl
from jax.experimental.pallas import tpu as pltpu

# ---- problem sizes ----------------------------------------------------------
B = 256                      # batch (multiple of B_TILE so every store is full-lane)
QDIM = 4                     # generalized-coordinate dimension
HIDDEN_SIZES = (32, 32, 16)  # LNMLP: hidden=[32, 32], output embed dim = 16
H1, H2, OUT = HIDDEN_SIZES
B_TILE = 128                 # batch tile on the lane axis
LN_EPS = 1e-5                # torch.nn.LayerNorm default


def _layernorm_over_features(z, gamma, beta):
    """LayerNorm over the feature axis (axis 0) of a (feat, batch_tile) tile."""
    mu = jnp.mean(z, axis=0, keepdims=True)                    # (1, Bt)
    var = jnp.mean(jnp.square(z - mu), axis=0, keepdims=True)  # (1, Bt)
    inv = jax.lax.rsqrt(var + LN_EPS)                          # EUP, ~free slot
    return (z - mu) * inv * gamma + beta


def shared_mmv_embed_kernel(xT_ref, w1_ref, w2_ref, w3_ref, slab_ref, outT_ref):
    """Fused LNMLP forward in feature-major layout (batch on lanes).

    xT_ref  : (QDIM, B_TILE)  input coordinates, batch on lanes
    w*_ref  : PyTorch-layout weights (out_features, in_features)
    slab_ref: (H1, 8) packed per-feature params:
              cols = [b1, g1, be1, b2, g2, be2, b3(padded), 0]
    outT_ref: (OUT, B_TILE)   embedding, batch on lanes (lane-dense store)
    """
    x = xT_ref[...]                          # (QDIM, Bt)
    slab = slab_ref[...]                     # (32, 8)

    b1, g1, be1 = slab[:H1, 0:1], slab[:H1, 1:2], slab[:H1, 2:3]
    b2, g2, be2 = slab[:H2, 3:4], slab[:H2, 4:5], slab[:H2, 5:6]
    b3 = slab[:OUT, 6:7]

    # layer 1: Linear -> LayerNorm -> Tanh
    z1 = jnp.dot(w1_ref[...], x, preferred_element_type=jnp.float32) + b1   # (H1, Bt)
    h1 = jnp.tanh(_layernorm_over_features(z1, g1, be1))

    # layer 2: Linear -> LayerNorm -> Tanh
    z2 = jnp.dot(w2_ref[...], h1, preferred_element_type=jnp.float32) + b2  # (H2, Bt)
    h2 = jnp.tanh(_layernorm_over_features(z2, g2, be2))

    # output layer: plain Linear
    outT_ref[...] = (
        jnp.dot(w3_ref[...], h2, preferred_element_type=jnp.float32) + b3   # (OUT, Bt)
    )


def shared_mmv_embed(q, params):
    """Wrapper: q (B, QDIM) -> embed (B, OUT), matching the PyTorch module."""
    w1, b1, g1, be1, w2, b2, g2, be2, w3, b3 = params
    batch = q.shape[0]
    assert batch % B_TILE == 0, "batch must be a multiple of B_TILE"

    # Pack the tiny per-feature vectors into one padded slab (1 DMA instead of 7).
    maxh = max(H1, H2, OUT)
    slab = jnp.zeros((maxh, 8), jnp.float32)
    slab = slab.at[:H1, 0].set(b1).at[:H1, 1].set(g1).at[:H1, 2].set(be1)
    slab = slab.at[:H2, 3].set(b2).at[:H2, 4].set(g2).at[:H2, 5].set(be2)
    slab = slab.at[:OUT, 6].set(b3)

    qT = q.T                                    # (QDIM, B): batch on lanes

    outT = pl.pallas_call(
        shared_mmv_embed_kernel,
        out_shape=jax.ShapeDtypeStruct((OUT, batch), jnp.float32),
        grid=(batch // B_TILE,),
        in_specs=[
            pl.BlockSpec((QDIM, B_TILE), lambda i: (0, i)),   # streamed per tile
            pl.BlockSpec(w1.shape, lambda i: (0, 0)),          # VMEM-resident
            pl.BlockSpec(w2.shape, lambda i: (0, 0)),          # VMEM-resident
            pl.BlockSpec(w3.shape, lambda i: (0, 0)),          # VMEM-resident
            pl.BlockSpec(slab.shape, lambda i: (0, 0)),        # VMEM-resident
        ],
        out_specs=pl.BlockSpec((OUT, B_TILE), lambda i: (0, i)),
        compiler_params=pltpu.CompilerParams(
            dimension_semantics=("parallel",)),                # megacore on v7x
    )(qT, w1, w2, w3, slab)

    return outT.T                               # (B, OUT)


def reference(q, params):
    """Pure-JAX reference mirroring the PyTorch LNMLP semantics."""
    w1, b1, g1, be1, w2, b2, g2, be2, w3, b3 = params

    def ln(x, g, b):
        mu = x.mean(-1, keepdims=True)
        var = jnp.mean((x - mu) ** 2, axis=-1, keepdims=True)
        return (x - mu) / jnp.sqrt(var + LN_EPS) * g + b

    h = jnp.tanh(ln(q @ w1.T + b1, g1, be1))
    h = jnp.tanh(ln(h @ w2.T + b2, g2, be2))
    return h @ w3.T + b3


if __name__ == "__main__":
    key = jax.random.PRNGKey(0)
    ks = jax.random.split(key, 11)

    q = jax.random.normal(ks[0], (B, QDIM), dtype=jnp.float32)

    # deterministic synthetic parameters (PyTorch Linear layout: (out, in))
    w1 = jax.random.normal(ks[1], (H1, QDIM), jnp.float32) * 0.5
    b1 = jax.random.normal(ks[2], (H1,), jnp.float32) * 0.1
    g1 = 1.0 + 0.1 * jax.random.normal(ks[3], (H1,), jnp.float32)
    be1 = jax.random.normal(ks[4], (H1,), jnp.float32) * 0.1
    w2 = jax.random.normal(ks[5], (H2, H1), jnp.float32) * 0.2
    b2 = jax.random.normal(ks[6], (H2,), jnp.float32) * 0.1
    g2 = 1.0 + 0.1 * jax.random.normal(ks[7], (H2,), jnp.float32)
    be2 = jax.random.normal(ks[8], (H2,), jnp.float32) * 0.1
    w3 = jax.random.normal(ks[9], (OUT, H2), jnp.float32) * 0.2
    b3 = jax.random.normal(ks[10], (OUT,), jnp.float32) * 0.1
    params = (w1, b1, g1, be1, w2, b2, g2, be2, w3, b3)

    out = shared_mmv_embed(q, params)
    out = jax.block_until_ready(out)

    ref = reference(q, params)
    assert out.shape == (B, OUT)
    assert jnp.allclose(out, ref, atol=1e-3, rtol=1e-3), float(
        jnp.max(jnp.abs(out - ref)))

    print("KERNEL_OK")
</pallas_src>

<mosaic_0001>
module attributes {stable_mosaic.version = 11 : i64} {
  func.func @shared_mmv_embed_kernel(%arg0: i32, %arg1: memref<4x128xf32, #tpu.memory_space<vmem>>, %arg2: memref<32x4xf32, #tpu.memory_space<vmem>>, %arg3: memref<32x32xf32, #tpu.memory_space<vmem>>, %arg4: memref<16x32xf32, #tpu.memory_space<vmem>>, %arg5: memref<32x8xf32, #tpu.memory_space<vmem>>, %arg6: memref<16x128xf32, #tpu.memory_space<vmem>>) attributes {dimension_semantics = [#tpu.dimension_semantics<parallel>], iteration_bounds = array<i64: 2>, scalar_prefetch = 0 : i64, scratch_operands = 0 : i64, tpu.core_type = #tpu.core_type<tc>, window_params = [{transform_indices = @transform_0, window_bounds = array<i64: 4, 128>}, {pipeline_mode = #tpu.pipeline_mode<synchronous>, transform_indices = @transform_1, window_bounds = array<i64: 32, 4>}, {pipeline_mode = #tpu.pipeline_mode<synchronous>, transform_indices = @transform_2, window_bounds = array<i64: 32, 32>}, {pipeline_mode = #tpu.pipeline_mode<synchronous>, transform_indices = @transform_3, window_bounds = array<i64: 16, 32>}, {pipeline_mode = #tpu.pipeline_mode<synchronous>, transform_indices = @transform_4, window_bounds = array<i64: 32, 8>}, {transform_indices = @transform_5, window_bounds = array<i64: 16, 128>}]} {
    %c0 = arith.constant 0 : index
    %c0_0 = arith.constant 0 : index
    %0 = vector.load %arg1[%c0, %c0_0] : memref<4x128xf32, #tpu.memory_space<vmem>>, vector<4x128xf32>
    %c0_1 = arith.constant 0 : index
    %c0_2 = arith.constant 0 : index
    %1 = vector.load %arg5[%c0_1, %c0_2] : memref<32x8xf32, #tpu.memory_space<vmem>>, vector<32x8xf32>
    %2 = vector.extract_strided_slice %1 {offsets = [0, 0], sizes = [32, 1], strides = [1, 1]} : vector<32x8xf32> to vector<32x1xf32>
    %3 = vector.extract_strided_slice %1 {offsets = [0, 1], sizes = [32, 1], strides = [1, 1]} : vector<32x8xf32> to vector<32x1xf32>
    %4 = vector.extract_strided_slice %1 {offsets = [0, 2], sizes = [32, 1], strides = [1, 1]} : vector<32x8xf32> to vector<32x1xf32>
    %5 = vector.extract_strided_slice %1 {offsets = [0, 3], sizes = [32, 1], strides = [1, 1]} : vector<32x8xf32> to vector<32x1xf32>
    %6 = vector.extract_strided_slice %1 {offsets = [0, 4], sizes = [32, 1], strides = [1, 1]} : vector<32x8xf32> to vector<32x1xf32>
    %7 = vector.extract_strided_slice %1 {offsets = [0, 5], sizes = [32, 1], strides = [1, 1]} : vector<32x8xf32> to vector<32x1xf32>
    %8 = vector.extract_strided_slice %1 {offsets = [0, 6], sizes = [16, 1], strides = [1, 1]} : vector<32x8xf32> to vector<16x1xf32>
    %c0_3 = arith.constant 0 : index
    %c0_4 = arith.constant 0 : index
    %9 = vector.load %arg2[%c0_3, %c0_4] : memref<32x4xf32, #tpu.memory_space<vmem>>, vector<32x4xf32>
    %cst = arith.constant dense<0.000000e+00> : vector<32x128xf32>
    %10 = tpu.matmul %9, %0, %cst {dimension_numbers = #tpu.dot_dimension_numbers<[1], [0], [0], [1], [0, 0, 1, 1], [], []>} : vector<32x4xf32>, vector<4x128xf32>, vector<32x128xf32> -> vector<32x128xf32>
    %11 = vector.broadcast %2 : vector<32x1xf32> to vector<32x128xf32>
    %12 = arith.addf %10, %11 : vector<32x128xf32>
    %cst_5 = arith.constant dense<0.000000e+00> : vector<128xf32>
    %13 = vector.multi_reduction <add>, %12, %cst_5 [0] : vector<32x128xf32> to vector<128xf32>
    %14 = vector.shape_cast %13 : vector<128xf32> to vector<1x128xf32>
    %cst_6 = arith.constant 3.200000e+01 : f32
    %15 = vector.broadcast %cst_6 : f32 to vector<1x128xf32>
    %16 = arith.divf %14, %15 : vector<1x128xf32>
    %17 = vector.broadcast %16 : vector<1x128xf32> to vector<32x128xf32>
    %18 = arith.subf %12, %17 : vector<32x128xf32>
    %19 = arith.mulf %18, %18 : vector<32x128xf32>
    %cst_7 = arith.constant dense<0.000000e+00> : vector<128xf32>
    %20 = vector.multi_reduction <add>, %19, %cst_7 [0] : vector<32x128xf32> to vector<128xf32>
    %21 = vector.shape_cast %20 : vector<128xf32> to vector<1x128xf32>
    %cst_8 = arith.constant 3.200000e+01 : f32
    %22 = vector.broadcast %cst_8 : f32 to vector<1x128xf32>
    %23 = arith.divf %21, %22 : vector<1x128xf32>
    %cst_9 = arith.constant 9.99999974E-6 : f32
    %24 = vector.broadcast %cst_9 : f32 to vector<1x128xf32>
    %25 = arith.addf %23, %24 : vector<1x128xf32>
    %26 = math.rsqrt %25 : vector<1x128xf32>
    %27 = vector.broadcast %16 : vector<1x128xf32> to vector<32x128xf32>
    %28 = arith.subf %12, %27 : vector<32x128xf32>
    %29 = vector.broadcast %26 : vector<1x128xf32> to vector<32x128xf32>
    %30 = arith.mulf %28, %29 : vector<32x128xf32>
    %31 = vector.broadcast %3 : vector<32x1xf32> to vector<32x128xf32>
    %32 = arith.mulf %30, %31 : vector<32x128xf32>
    %33 = vector.broadcast %4 : vector<32x1xf32> to vector<32x128xf32>
    %34 = arith.addf %32, %33 : vector<32x128xf32>
    %35 = math.tanh %34 : vector<32x128xf32>
    %c0_10 = arith.constant 0 : index
    %c0_11 = arith.constant 0 : index
    %36 = vector.load %arg3[%c0_10, %c0_11] : memref<32x32xf32, #tpu.memory_space<vmem>>, vector<32x32xf32>
    %cst_12 = arith.constant dense<0.000000e+00> : vector<32x128xf32>
    %37 = tpu.matmul %36, %35, %cst_12 {dimension_numbers = #tpu.dot_dimension_numbers<[1], [0], [0], [1], [0, 0, 1, 1], [], []>} : vector<32x32xf32>, vector<32x128xf32>, vector<32x128xf32> -> vector<32x128xf32>
    %38 = vector.broadcast %5 : vector<32x1xf32> to vector<32x128xf32>
    %39 = arith.addf %37, %38 : vector<32x128xf32>
    %cst_13 = arith.constant dense<0.000000e+00> : vector<128xf32>
    %40 = vector.multi_reduction <add>, %39, %cst_13 [0] : vector<32x128xf32> to vector<128xf32>
    %41 = vector.shape_cast %40 : vector<128xf32> to vector<1x128xf32>
    %cst_14 = arith.constant 3.200000e+01 : f32
    %42 = vector.broadcast %cst_14 : f32 to vector<1x128xf32>
    %43 = arith.divf %41, %42 : vector<1x128xf32>
    %44 = vector.broadcast %43 : vector<1x128xf32> to vector<32x128xf32>
    %45 = arith.subf %39, %44 : vector<32x128xf32>
    %46 = arith.mulf %45, %45 : vector<32x128xf32>
    %cst_15 = arith.constant dense<0.000000e+00> : vector<128xf32>
    %47 = vector.multi_reduction <add>, %46, %cst_15 [0] : vector<32x128xf32> to vector<128xf32>
    %48 = vector.shape_cast %47 : vector<128xf32> to vector<1x128xf32>
    %cst_16 = arith.constant 3.200000e+01 : f32
    %49 = vector.broadcast %cst_16 : f32 to vector<1x128xf32>
    %50 = arith.divf %48, %49 : vector<1x128xf32>
    %cst_17 = arith.constant 9.99999974E-6 : f32
    %51 = vector.broadcast %cst_17 : f32 to vector<1x128xf32>
    %52 = arith.addf %50, %51 : vector<1x128xf32>
    %53 = math.rsqrt %52 : vector<1x128xf32>
    %54 = vector.broadcast %43 : vector<1x128xf32> to vector<32x128xf32>
    %55 = arith.subf %39, %54 : vector<32x128xf32>
    %56 = vector.broadcast %53 : vector<1x128xf32> to vector<32x128xf32>
    %57 = arith.mulf %55, %56 : vector<32x128xf32>
    %58 = vector.broadcast %6 : vector<32x1xf32> to vector<32x128xf32>
    %59 = arith.mulf %57, %58 : vector<32x128xf32>
    %60 = vector.broadcast %7 : vector<32x1xf32> to vector<32x128xf32>
    %61 = arith.addf %59, %60 : vector<32x128xf32>
    %62 = math.tanh %61 : vector<32x128xf32>
    %c0_18 = arith.constant 0 : index
    %c0_19 = arith.constant 0 : index
    %63 = vector.load %arg4[%c0_18, %c0_19] : memref<16x32xf32, #tpu.memory_space<vmem>>, vector<16x32xf32>
    %cst_20 = arith.constant dense<0.000000e+00> : vector<16x128xf32>
    %64 = tpu.matmul %63, %62, %cst_20 {dimension_numbers = #tpu.dot_dimension_numbers<[1], [0], [0], [1], [0, 0, 1, 1], [], []>} : vector<16x32xf32>, vector<32x128xf32>, vector<16x128xf32> -> vector<16x128xf32>
    %65 = vector.broadcast %8 : vector<16x1xf32> to vector<16x128xf32>
    %66 = arith.addf %64, %65 : vector<16x128xf32>
    %c0_21 = arith.constant 0 : index
    %c0_22 = arith.constant 0 : index
    %67 = vector.load %arg6[%c0_21, %c0_22] : memref<16x128xf32, #tpu.memory_space<vmem>>, vector<16x128xf32>
    tpu.vector_store %arg6[%c0_21, %c0_22], %66 {strides = array<i32>} : memref<16x128xf32, #tpu.memory_space<vmem>>, vector<16x128xf32>,
    return
  }
  func.func @transform_0(%arg0: i32) -> (i32, i32) {
    %c0_i32 = arith.constant 0 : i32
    %c0_i32_0 = arith.constant 0 : i32
    return %c0_i32, %arg0 : i32, i32
  }
  func.func @transform_1(%arg0: i32) -> (i32, i32) {
    %c0_i32 = arith.constant 0 : i32
    %c0_i32_0 = arith.constant 0 : i32
    %c0_i32_1 = arith.constant 0 : i32
    return %c0_i32, %c0_i32_0 : i32, i32
  }
  func.func @transform_2(%arg0: i32) -> (i32, i32) {
    %c0_i32 = arith.constant 0 : i32
    %c0_i32_0 = arith.constant 0 : i32
    %c0_i32_1 = arith.constant 0 : i32
    return %c0_i32, %c0_i32_0 : i32, i32
  }
  func.func @transform_3(%arg0: i32) -> (i32, i32) {
    %c0_i32 = arith.constant 0 : i32
    %c0_i32_0 = arith.constant 0 : i32
    %c0_i32_1 = arith.constant 0 : i32
    return %c0_i32, %c0_i32_0 : i32, i32
  }
  func.func @transform_4(%arg0: i32) -> (i32, i32) {
    %c0_i32 = arith.constant 0 : i32
    %c0_i32_0 = arith.constant 0 : i32
    %c0_i32_1 = arith.constant 0 : i32
    return %c0_i32, %c0_i32_0 : i32, i32
  }
  func.func @transform_5(%arg0: i32) -> (i32, i32) {
    %c0_i32 = arith.constant 0 : i32
    %c0_i32_0 = arith.constant 0 : i32
    return %c0_i32, %arg0 : i32, i32
  }
}

</mosaic_0001>

<bundles_post_ra>
// kernel: tpu_custom_call.1
= control target key start
LH: loop header
LB: loop body
LE: loop exit
PB: predicated region body
PF: predicated region fallthrough
CT: control target
= control target key end

     0   :  { %10 = vsyncpa [#allocation3], 0  ;;  %s1054_s0 = inlined_call_operand.vmem [shape: f32[4,256], index: 0, kind: input, shape index: {}]   ;;  %s1055_s1 = inlined_call_operand.vmem [shape: f32[32,4], index: 1, kind: input, shape index: {}]   ;;  %s1056_s2 = inlined_call_operand.vmem [shape: f32[32,32], index: 2, kind: input, shape index: {}]   ;;  %s1057_s3 = inlined_call_operand.vmem [shape: f32[16,32], index: 3, kind: input, shape index: {}]   ;;  %s1058_s4 = inlined_call_operand.vmem [shape: f32[32,8], index: 4, kind: input, shape index: {}]   ;;  %s1059_s5 = inlined_call_operand.hbm [shape: f32[16,256], index: 5, kind: output, shape index: {}]  }
   0x1   :  { %12 = vsyncpa [#allocation3 + $0x1], 0  ;;  %s877_s18 = smov 0   ;;  %s879_s19 = smov 0  }
   0x2   :  { %s881_s20 = smov 0   ;;  %s883_s21 = smov 0  }
   0x3 LB: > { %s898_s22 = sadd.s32 4294967295, %s834_s21   ;;  %s656_s23 = sadd.s32 4294967294, %s834_s21   ;;  %s834_s21 = sphi %s883_s21, %s1065_s21   ;;  %s830_s20 = sphi %s881_s20, %s1064_s20   ;;  %s826_s19 = sphi %s879_s19, %s1063_s19   ;;  %s822_s18 = sphi %s877_s18, %s1062_s18  }
   0x4   : > { %s902_s24 = sadd.s32 1, %s834_s21   ;;  %s135_s25 = sadd.s32 1, %s830_s20 }
   0x5   : > { %s132_s26 = ssub.s32 %s834_s21, %s902_s24  ;;  %p145_p0 = scmp.ne.s32.totalorder %s830_s20, %s826_s19 }
   0x6   : > { %p133_p1 = scmp.eq.s32.totalorder %s132_s26, 0  ;;  %p146_p2 = scmp.eq.s32.totalorder %s898_s22, 1 }
   0x7   : > { %p151_p3 = scmp.ne.s32.totalorder %s826_s19, %s822_s18  ;;  %p152_p4 = scmp.eq.s32.totalorder %s656_s23, 1 }
   0x8   : > { %s913_s27 = scalar_select %p133_p1, %s830_s20, %s135_s25  }
   0x9   : > { %p915_p5 = por %p146_p2, %p145_p0  ;;  %p919_p6 = por %p152_p4, %p151_p3 }
   0xa   : > { %p659_p7 = scmp.ge.s32.totalorder %s834_s21, 1  ;;  %p189_p8 = scmp.lt.s32.totalorder %s834_s21, 3 }
   0xc   : > { %p190_p9 = pnand %p659_p7, %p189_p8 }
   0xd   : > { %p216_p10 = scmp.lt.s32.totalorder (!%p190_p9), %s898_s22, 1  ;;  %s213_s6 = sand.u32 (!%p190_p9), 1, %s826_s19  }
   0xe   : > { %193 = sbr.rel (%p190_p9) target bundleno = 628 (0x274), region = 40  ;;  %s660_s7 = sshll.u32 (!%p190_p9), %s213_s6, 4 }
   0xf   : > { %s674_s8 = sshll.u32 (!%p190_p9), %s898_s22, 3  ;;  %s792_s25 = scalar_lea.hbm (!%p190_p9), %s1059_s5, 32 }
  0x13   : > { %v836_v0 = vmov 0   ;;  %v929_v1 = vld [vmem:[%s1058_s4] sm:$0xff]  ;;  %v934_v2 = vld [vmem:[%s1058_s4 + $0x10] sm:$0xff]  ;;  %s217_s9 = scalar_select %p216_p10, %s898_s22, 1  ;;  %v942_v3 = vld [vmem:[%s1058_s4 + $0x18] sm:$0xff]  ;;  %v837_v4 = vmov 1  }
  0x14   : > { %732 = vset.pattern.permute.xlu0 %v836_v0  ;;  %733 = vset.pattern.permute.xlu1 %v836_v0  ;;  %vm262_vm0 = vcmask 1043456   ;;  %v225_v5 = vld [vmem:[%s1055_s1] sm:$0xff]  ;;  %vm249_vm1 = vcmask 31744   ;;  %v228_v6 = vld [vmem:[%s1055_s1 + $0x18] sm:$0xff]  ;;  %v957_v8 = vld [vmem:[%s1058_s4 + $0x8] sm:$0xff]  ;;  %v838_v10 = vmov 2  }
  0x15   : > { %231 = vperm.xlu0 %732, %v929_v1   ;;  %241 = vperm.xlu1 %733, %v934_v2   ;;  %s661_s12 = sshll.u32 %s217_s9, 2  ;;  %v226_v9 = vld [vmem:[%s1055_s1 + $0x8] sm:$0xff]  ;;  %v227_v11 = vld [vmem:[%s1055_s1 + $0x10] sm:$0xff]  ;;  %v839_v15 = vmov 32.0   ;;  %vm409_vm6 = vcmask 261120   ;;  %s215_s9 = scalar_lea.vmem [#allocation2], %s660_s7 }
  0x16   : > { %734 = vset.pattern.permute.xlu2 %v837_v4  ;;  %s219_s15 = scalar_lea.vmem %s1054_s0, %s661_s12  ;;  %750 = vrcp.f32 %v839_v15  ;;  %s590_s12 = scalar_lea.hbm %s1059_s5, %s674_s8 }
  0x17   : > { %358 = vperm.xlu2 %734, %v942_v3   ;;  %v220_v7 = vld [vmem:[%s219_s15] sm:$0xf]  ;;  %s591_s13 = sshll.u32 %s215_s9, 4  ;;  %s593_s14 = sshll.u32 %s590_s12, 4  ;;  %s592_s13 = int_to_ptr.vmem [resolvable:$true] %s591_s13  ;;  %s594_s14 = int_to_ptr.hbm [resolvable:$true] %s593_s14 }
  0x18   : > { %662 = vmatpush.msk.msra.mxu0 %vm262_vm0, %v220_v7  ;;  %677 = vmatpush.msk.msra.mxu1 %vm262_vm0, %v220_v7  ;;  %s580_s15 = scalar_lea.sflag [#allocation3], %s213_s6  ;;  %s786_s16 = sshra.s32 %s594_s14, 4  ;;  %s787_s16 = int_to_ptr.hbm [resolvable:$true] %s786_s16 }
  0x19   : > { %663 = vmatmul.msk.f32.vlgmr.msra.gmra.mxu0 %vm249_vm1, %v225_v5  ;;  %666 = vmatmul.msk.f32.vlgmr.msra.gmra.mxu1 %vm249_vm1, %v228_v6  ;;  %s788_s22 = scalar_lea.hbm %s787_s16, 16  ;;  %p793_p0 = scmp.lt.s32.totalorder %s787_s16, %s1059_s5 }
  0x1a   : > { %p789_p11 = scmp.ne.s32.totalorder %s787_s16, %s788_s22  ;;  %p794_p1 = scmp.lt.s32.totalorder %s792_s25, %s788_s22 }
  0x1c   : > { %v751_v18 = vpop.eup %750  ;;  %p790_p12 = pnand %p789_p11, %p915_p5  ;;  %p795_p2 = por %p794_p1, %p793_p0 }
  0x1d   : > { %236 = vperm.xlu0 %732, %v957_v8   ;;  %246 = vperm.xlu1 %733, %v942_v3   ;;  %v305_v24 = vmul.f32 32.0, %v751_v18  ;;  %vm309_vm2 = vweird.f32 %v751_v18 }
  0x1e   : > { %p791_p13 = pneg %p790_p12 }
  0x1f   : > { %354 = vperm.xlu2 %734, %v934_v2   ;;  %v306_v29 = vsub.f32 1.0, %v305_v24 }
  0x20   : > { %p796_p3 = pnand %p795_p2, %p791_p13 }
  0x21   : > { %664 = vmatmul.msk.f32.gmra.mxu0 %vm249_vm1, %v226_v9  ;;  %v307_v32 = vmul.f32 %v751_v18, %v306_v29 }
  0x23   : > { %v308_v35 = vadd.f32 %v751_v18, %v307_v32  ;;  %v390_v32 = vld [vmem:[%s1056_s2 + $0x8] sm:$0xff] }
  0x25   : > { %736 = vset.pattern.permute.xlu1 %v837_v4  ;;  %735 = vset.pattern.permute.xlu0 %v838_v10  ;;  %v978_v38 = vsel %vm309_vm2, %v751_v18, %v308_v35  ;;  %v842_v35 = vmov 5  }
  0x26   : > { %350 = vperm.xlu1 %736, %v957_v8   ;;  %378 = vperm.xlu0 %735, %v942_v3  }
  0x27   : > { %737 = vset.pattern.permute.xlu2 %v838_v10 }
  0x28   : > { %374 = vperm.xlu2 %737, %v934_v2  }
  0x29   : > { %665 = vmatmul.msk.f32.gmra.mxu0 %vm249_vm1, %v227_v11  ;;  %v840_v11 = vmov 3  }
  0x2e   : > { %346 = vperm.xlu1 %736, %v929_v1   ;;  %366 = vperm.xlu0 %735, %v929_v1  }
  0x30   : > { %370 = vperm.xlu2 %737, %v957_v8  }
  0x36   : > { %738 = vset.pattern.permute.xlu1 %v840_v11  ;;  %740 = vset.pattern.permute.xlu0 %v840_v11 }
  0x37   : > { %394 = vperm.xlu1 %738, %v929_v1   ;;  %402 = vperm.xlu0 %740, %v934_v2  }
  0x38   : > { %739 = vset.pattern.permute.xlu2 %v840_v11 }
  0x39   : > { %398 = vperm.xlu2 %739, %v957_v8  }
  0x3f   : > { %406 = vperm.xlu1 %738, %v942_v3  }
  0x71   : > { %v359_v57 = vpop.permute.xlu2 %358 }
  0x79   : > { %v355_v61 = vpop.permute.xlu2 %354 }
  0x82   : > { %v375_v7 = vpop.permute.xlu2 %374 }
  0x87   : > { %v232_v13 = vpop.permute.xlu0 %231  ;;  %v242_v14 = vpop.permute.xlu1 %241 }
  0x8a   : > { %v371_v24 = vpop.permute.xlu2 %370 }
  0x8f   : > { %v237_v17 = vpop.permute.xlu0 %236  ;;  %v247_v21 = vpop.permute.xlu1 %246 }
  0x96   : > { %v283_v12 = vpop.f32.mrf.mxu0  ;;  %v292_v22 = vpop.f32.mrf.mxu1 }
  0x97   : > { %v284_v20 = vadd.f32 %v283_v12, %v232_v13  ;;  %v293_v27 = vadd.f32 %v292_v22, %v247_v21 }
  0x98   : > { %v351_v5 = vpop.permute.xlu1 %350  ;;  %v379_v10 = vpop.permute.xlu0 %378 }
  0x9e   : > { %v286_v16 = vpop.f32.mrf.mxu0 }
  0x9f   : > { %v287_v19 = vadd.f32 %v286_v16, %v237_v17 }
  0xa0   : > { %v347_v21 = vpop.permute.xlu1 %346 }
  0xa1   : > { %v295_v25 = vadd.f32 %v287_v19, %v284_v20 }
  0xa6   : > { %v289_v23 = vpop.f32.mrf.mxu0 }
  0xa7   : > { %v290_v26 = vadd.f32 %v289_v23, %v242_v14 }
  0xa9   : > { %v296_v28 = vadd.f32 %v295_v25, %v290_v26 }
  0xab   : > { %v297_v30 = vadd.f32 %v296_v28, %v293_v27 }
  0xad   : > { %v298_v31 = vrot.slane %v297_v30, 4 }
  0xaf   : > { %v299_v33 = vadd.f32 %v298_v31, %v297_v30 }
  0xb1   : > { %v300_v34 = vrot.slane %v299_v33, 2 }
  0xb3   : > { %v301_v36 = vadd.f32 %v300_v34, %v299_v33  ;;  %v389_v33 = vld [vmem:[%s1056_s2] sm:$0xff] }
  0xb5   : > { %v302_v37 = vrot.slane %v301_v36, 1 }
  0xb7   : > { %v303_v39 = vadd.f32 %v302_v37, %v301_v36  ;;  %v391_v36 = vld [vmem:[%s1056_s2 + $0x10] sm:$0xff]  ;;  %v392_v37 = vld [vmem:[%s1056_s2 + $0x18] sm:$0xff] }
  0xb9   : > { %v311_v40 = vmul.f32 %v978_v38, %v303_v39  ;;  %v395_v39 = vpop.permute.xlu1 %394 }
  0xbb   : > { %v312_v41 = vsub.f32 %v284_v20, %v311_v40  ;;  %v313_v42 = vsub.f32 %v287_v19, %v311_v40  ;;  %v314_v43 = vsub.f32 %v290_v26, %v311_v40  ;;  %v315_v46 = vsub.f32 %v293_v27, %v311_v40  ;;  %v367_v27 = vpop.permute.xlu0 %366  ;;  %v399_v40 = vpop.permute.xlu2 %398 }
  0xbc   : > { %v841_v26 = vmov 4  }
  0xbd   : > { %v316_v44 = vmul.f32 %v312_v41, %v312_v41  ;;  %v317_v45 = vmul.f32 %v313_v42, %v313_v42  ;;  %v318_v47 = vmul.f32 %v314_v43, %v314_v43  ;;  %v319_v50 = vmul.f32 %v315_v46, %v315_v46  ;;  %744 = vset.pattern.permute.xlu0 %v841_v26 }
  0xbe   : > { %499 = vperm.xlu0 %744, %v957_v8   ;;  %741 = vset.pattern.permute.xlu2 %v841_v26 }
  0xbf   : > { %v320_v48 = vadd.f32 %v317_v45, %v316_v44  ;;  %507 = vperm.xlu2 %741, %v942_v3   ;;  %742 = vset.pattern.permute.xlu1 %v841_v26 }
  0xc0   : > { %503 = vperm.xlu1 %742, %v934_v2  }
  0xc1   : > { %v321_v49 = vadd.f32 %v320_v48, %v318_v47  ;;  %v407_v47 = vpop.permute.xlu1 %406 }
  0xc3   : > { %v322_v51 = vadd.f32 %v321_v49, %v319_v50 }
  0xc5   : > { %v323_v52 = vrot.slane %v322_v51, 4 }
  0xc7   : > { %v324_v53 = vadd.f32 %v323_v52, %v322_v51  ;;  %743 = vset.pattern.permute.xlu2 %v842_v35 }
  0xc8   : > { %527 = vperm.xlu2 %743, %v942_v3   ;;  %745 = vset.pattern.permute.xlu1 %v842_v35 }
  0xc9   : > { %v325_v54 = vrot.slane %v324_v53, 2  ;;  %523 = vperm.xlu1 %745, %v934_v2  }
  0xcb   : > { %v326_v55 = vadd.f32 %v325_v54, %v324_v53 }
  0xcd   : > { %v327_v56 = vrot.slane %v326_v55, 1 }
  0xcf   : > { %v328_v58 = vadd.f32 %v327_v56, %v326_v55 }
  0xd0   : > { %746 = vset.pattern.permute.xlu2 %v841_v26 }
  0xd1   : > { %v329_v59 = vmul.f32 %v328_v58, %v978_v38  ;;  %495 = vperm.xlu2 %746, %v929_v1   ;;  %519 = vperm.xlu1 %745, %v957_v8  }
  0xd3   : > { %v330_v60 = vadd.f32 1e-05, %v329_v59 }
  0xd5   : > { %752 = vrsqrt.f32 %v330_v60  ;;  %vm337_vm4 = vweird.f32 %v330_v60 }
  0xd9   : > { %747 = vset.pattern.permute.xlu2 %v842_v35 }
  0xda   : > { %515 = vperm.xlu2 %747, %v929_v1  }
  0xdb   : > { %v753_v62 = vpop.eup %752 }
  0xdc   : > { %v332_v63 = vmul.f32 %v753_v62, %v330_v60  ;;  %vm338_vm3 = vweird.f32 %v753_v62 }
  0xdd   : > { %vm339_vm5 = vmor %vm337_vm4, %vm338_vm3 }
  0xde   : > { %v333_v0 = vmul.f32 %v753_v62, %v332_v63 }
  0xe0   : > { %v334_v4 = vmul.f32 0.5, %v333_v0 }
  0xe2   : > { %v335_v6 = vsub.f32 1.5, %v334_v4 }
  0xe4   : > { %v336_v9 = vmul.f32 %v753_v62, %v335_v6 }
  0xe6   : > { %v340_v12 = vsel %vm339_vm5, %v753_v62, %v336_v9 }
  0xe7   : > { %v344_v13 = vmul.f32 %v340_v12, %v315_v46  ;;  %v343_v14 = vmul.f32 %v340_v12, %v314_v43  ;;  %v342_v15 = vmul.f32 %v340_v12, %v313_v42  ;;  %v341_v16 = vmul.f32 %v340_v12, %v312_v41  ;;  %v403_v42 = vpop.permute.xlu0 %402 }
  0xe9   : > { %v364_v17 = vmul.f32 %v359_v57, %v344_v13  ;;  %v363_v18 = vmul.f32 %v355_v61, %v343_v14  ;;  %v362_v19 = vmul.f32 %v351_v5, %v342_v15  ;;  %v361_v23 = vmul.f32 %v347_v21, %v341_v16 }
  0xeb   : > { %v384_v20 = vadd.f32 %v379_v10, %v364_v17  ;;  %v383_v22 = vadd.f32 %v375_v7, %v363_v18  ;;  %v382_v25 = vadd.f32 %v371_v24, %v362_v19  ;;  %v381_v28 = vadd.f32 %v367_v27, %v361_v23 }
  0xed   : > { %754 = vtanh.f32 %v384_v20 }
  0xee   : > { %756 = vtanh.f32 %v383_v22 }
  0xef   : > { %758 = vtanh.f32 %v382_v25 }
  0xf0   : > { %760 = vtanh.f32 %v381_v28 }
  0xf3   : > { %v755_v29 = vpop.eup %754 }
  0xf4   : > { %434 = vmatpush.msrb.mxu1 %v755_v29  ;;  %678 = vmatpush.msra.mxu3 %v755_v29  ;;  %v757_v30 = vpop.eup %756  ;;  %v843_v29 = vmov 6  }
  0xf5   : > { %v759_v31 = vpop.eup %758  ;;  %748 = vset.pattern.permute.xlu0 %v843_v29  ;;  %749 = vset.pattern.permute.xlu1 %v843_v29 }
  0xf6   : > { %435 = vmatpush.msrb.mxu1 %v757_v30  ;;  %679 = vmatpush.msra.mxu3 %v757_v30  ;;  %v761_v34 = vpop.eup %760 }
  0xf7   : > { %541 = vperm.xlu0 %748, %v929_v1   ;;  %545 = vperm.xlu1 %749, %v957_v8  }
  0xf8   : > { %436 = vmatpush.msrb.mxu1 %v759_v31  ;;  %680 = vmatpush.msra.mxu3 %v759_v31 }
  0xfa   : > { %437 = vmatpush.msrb.mxu1 %v761_v34  ;;  %681 = vmatpush.msra.mxu3 %v761_v34 }
  0xfb   : > { %668 = vmatmul.msk.f32.vlgmr.msra.gmra.mxu3 %vm409_vm6, %v390_v32  ;;  %667 = vmatmul.msk.f32.vlgmr.msrb.gmra.mxu1 %vm409_vm6, %v389_v33 }
 0x103   : > { %669 = vmatmul.msk.f32.gmra.mxu3 %vm409_vm6, %v391_v36 }
 0x10b   : > { %670 = vmatmul.msk.f32.gmra.mxu3 %vm409_vm6, %v392_v37 }
 0x119   : > { %v508_v15 = vpop.permute.xlu2 %507 }
 0x122   : > { %v528_v20 = vpop.permute.xlu2 %527 }
 0x12b   : > { %v496_v27 = vpop.permute.xlu2 %495 }
 0x130   : > { %v500_v30 = vpop.permute.xlu0 %499 }
 0x132   : > { %v504_v19 = vpop.permute.xlu1 %503 }
 0x13b   : > { %v524_v26 = vpop.permute.xlu1 %523 }
 0x178   : > { %v439_v2 = vpop.f32.mrf.mxu1 }
 0x179   : > { %v440_v43 = vadd.f32 %v439_v2, %v395_v39  ;;  %v520_v2 = vpop.permute.xlu1 %519 }
 0x17e   : > { %v442_v3 = vpop.f32.mrf.mxu3 }
 0x17f   : > { %v443_v44 = vadd.f32 %v442_v3, %v399_v40 }
 0x181   : > { %v451_v46 = vadd.f32 %v443_v44, %v440_v43 }
 0x186   : > { %v445_v41 = vpop.f32.mrf.mxu3 }
 0x187   : > { %v446_v45 = vadd.f32 %v445_v41, %v403_v42  ;;  %v516_v41 = vpop.permute.xlu2 %515 }
 0x189   : > { %v452_v49 = vadd.f32 %v451_v46, %v446_v45 }
 0x18e   : > { %v448_v48 = vpop.f32.mrf.mxu3 }
 0x18f   : > { %v449_v50 = vadd.f32 %v448_v48, %v407_v47  ;;  %v539_v47 = vld [vmem:[%s1057_s3 + $0x8] sm:$0xff]  ;;  %v542_v48 = vpop.permute.xlu0 %541 }
 0x191   : > { %v453_v51 = vadd.f32 %v452_v49, %v449_v50 }
 0x193   : > { %v454_v52 = vrot.slane %v453_v51, 4 }
 0x195   : > { %v455_v53 = vadd.f32 %v454_v52, %v453_v51  ;;  %v546_v51 = vpop.permute.xlu1 %545 }
 0x197   : > { %v456_v54 = vrot.slane %v455_v53, 2 }
 0x199   : > { %v457_v55 = vadd.f32 %v456_v54, %v455_v53 }
 0x19b   : > { %v458_v56 = vrot.slane %v457_v55, 1 }
 0x19d   : > { %v459_v57 = vadd.f32 %v458_v56, %v457_v55 }
 0x19f   : > { %v460_v58 = vmul.f32 %v459_v57, %v978_v38 }
 0x1a1   : > { %v461_v59 = vsub.f32 %v440_v43, %v460_v58  ;;  %v462_v60 = vsub.f32 %v443_v44, %v460_v58  ;;  %v463_v61 = vsub.f32 %v446_v45, %v460_v58  ;;  %v464_v62 = vsub.f32 %v449_v50, %v460_v58  ;;  %v538_v45 = vld [vmem:[%s1057_s3] sm:$0xff] }
 0x1a3   : > { %v465_v63 = vmul.f32 %v461_v59, %v461_v59  ;;  %v466_v0 = vmul.f32 %v462_v60, %v462_v60  ;;  %v467_v4 = vmul.f32 %v463_v61, %v463_v61  ;;  %v468_v6 = vmul.f32 %v464_v62, %v464_v62 }
 0x1a5   : > { %v469_v5 = vadd.f32 %v466_v0, %v465_v63 }
 0x1a7   : > { %v470_v7 = vadd.f32 %v469_v5, %v467_v4 }
 0x1a9   : > { %v471_v9 = vadd.f32 %v470_v7, %v468_v6 }
 0x1ab   : > { %v472_v10 = vrot.slane %v471_v9, 4 }
 0x1ad   : > { %v473_v11 = vadd.f32 %v472_v10, %v471_v9 }
 0x1af   : > { %v474_v12 = vrot.slane %v473_v11, 2 }
 0x1b1   : > { %v475_v13 = vadd.f32 %v474_v12, %v473_v11 }
 0x1b3   : > { %v476_v14 = vrot.slane %v475_v13, 1 }
 0x1b5   : > { %v477_v16 = vadd.f32 %v476_v14, %v475_v13 }
 0x1b7   : > { %v478_v17 = vmul.f32 %v477_v16, %v978_v38 }
 0x1b9   : > { %v479_v18 = vadd.f32 1e-05, %v478_v17 }
 0x1bb   : > { %762 = vrsqrt.f32 %v479_v18  ;;  %vm486_vm8 = vweird.f32 %v479_v18 }
 0x1c1   : > { %v763_v21 = vpop.eup %762 }
 0x1c2   : > { %v481_v22 = vmul.f32 %v763_v21, %v479_v18  ;;  %vm487_vm7 = vweird.f32 %v763_v21 }
 0x1c3   : > { %vm488_vm9 = vmor %vm486_vm8, %vm487_vm7 }
 0x1c4   : > { %v482_v23 = vmul.f32 %v763_v21, %v481_v22 }
 0x1c6   : > { %v483_v24 = vmul.f32 0.5, %v482_v23 }
 0x1c8   : > { %v484_v25 = vsub.f32 1.5, %v483_v24 }
 0x1ca   : > { %v485_v28 = vmul.f32 %v763_v21, %v484_v25 }
 0x1cc   : > { %v489_v38 = vsel %vm488_vm9, %v763_v21, %v485_v28 }
 0x1cd   : > { %v493_v31 = vmul.f32 %v489_v38, %v464_v62  ;;  %v492_v32 = vmul.f32 %v489_v38, %v463_v61  ;;  %v490_v33 = vmul.f32 %v489_v38, %v461_v59  ;;  %v491_v34 = vmul.f32 %v489_v38, %v462_v60 }
 0x1cf   : > { %v513_v35 = vmul.f32 %v508_v15, %v493_v31  ;;  %v512_v36 = vmul.f32 %v504_v19, %v492_v32  ;;  %v511_v37 = vmul.f32 %v500_v30, %v491_v34  ;;  %v510_v40 = vmul.f32 %v496_v27, %v490_v33 }
 0x1d1   : > { %v533_v3 = vadd.f32 %v528_v20, %v513_v35  ;;  %v532_v39 = vadd.f32 %v524_v26, %v512_v36  ;;  %v531_v42 = vadd.f32 %v520_v2, %v511_v37  ;;  %v530_v1 = vadd.f32 %v516_v41, %v510_v40 }
 0x1d3   : > { %764 = vtanh.f32 %v533_v3 }
 0x1d4   : > { %766 = vtanh.f32 %v532_v39 }
 0x1d5   : > { %768 = vtanh.f32 %v531_v42 }
 0x1d6   : > { %770 = vtanh.f32 %v530_v1 }
 0x1d9   : > { %v765_v8 = vpop.eup %764 }
 0x1da   : > { %566 = vmatpush.msra.mxu2 %v765_v8  ;;  %v767_v43 = vpop.eup %766 }
 0x1db   : > { %v769_v44 = vpop.eup %768 }
 0x1dc   : > { %567 = vmatpush.msra.mxu2 %v767_v43  ;;  %v771_v46 = vpop.eup %770 }
 0x1de   : > { %568 = vmatpush.msra.mxu2 %v769_v44 }
 0x1e0   : > { %569 = vmatpush.msra.mxu2 %v771_v46 }
 0x1e1   : > { %671 = vmatmul.msk.f32.vlgmr.msra.gmra.mxu2 %vm409_vm6, %v538_v45 }
 0x1e9   : > { %672 = vmatmul.msk.f32.gmra.mxu2 %vm409_vm6, %v539_v47 }
 0x264   : > { %v571_v49 = vpop.f32.mrf.mxu2 }
 0x265   : > { %v572_v50 = vadd.f32 %v571_v49, %v542_v48 }
 0x267   : > { %577 = vst [vmem:[%s215_s9] sm:$0xff] %v572_v50 }
 0x26c   : > { %v574_v52 = vpop.f32.mrf.mxu2 }
 0x26d   : > { %v575_v53 = vadd.f32 %v574_v52, %v546_v51 }
 0x26f   : > { %578 = vst [vmem:[%s215_s9 + $0x8] sm:$0xff] %v575_v53 }
 0x270   : > { %799 = shalt.err (!%p796_p3)
}
 0x271   : > { %s844_s6 = smov 128   ;;  %s845_s7 = smov 256  }
 0x272   : > { %s846_s8 = smov 8  }
 0x273   : > { %682 = dma.vmem_to_hbm [thread:$0]  (%p915_p5), %s592_s13, 256, %s594_s14, %s580_s15, %s844_s6, %s845_s7, %s846_s8  }
 0x274 PF: > { %p688_p4 = scmp.ge.s32.totalorder %s834_s21, 2  ;;  %s608_s9 = sand.u32 1, %s822_s18  }
 0x275   : > { %s609_s10 = scalar_lea.sflag [#allocation3], %s608_s9 }
 0x276   : > { %p685_p7 = pnand %p688_p4, %p919_p6 }
 0x278   : > { %p686_p8 = pneg %p685_p7 }
 0x27a   : > { %817 = dma.done.wait (%p686_p8), %s609_s10, 256  }
 0x27b   : > { %819 = vsyncadd (%p686_p8), %s609_s10, 4294967040  ;;  %p15_p9 = scmp.ge.s32.totalorder %s902_s24, 4   ;;  %s1062_s18 = smov %s826_s19 }
 0x27c   : > { %s1063_s19 = smov %s830_s20  ;;  %s1064_s20 = smov %s913_s27 }
 0x27d   : > { %s1065_s21 = smov %s902_s24  ;;  %17 = sbr.rel (!%p15_p9) target bundleno = 3 (0x3), region = 75 }
 0x282   :  { %615 = vsyncpa [#allocation3], 1 }
 0x283   :  { %617 = vsyncpa [#allocation3 + $0x1], 1 }

</bundles_post_ra>
